<compile_context>
chip_gen: v5e
topology: v5e:2x2
jax: 0.10.0
libtpu: 0.0.40
codegen_flags: <defaults>
</compile_context>

<pallas_src>
import jax
import jax.numpy as jnp
import numpy as np
from jax import lax
from jax.experimental import pallas as pl
from jax.experimental.pallas import tpu as pltpu  # noqa: F401  (TPU backend)

# ---- model hyper-params (small, consistent with the module) ----
B, S, H = 2, 8, 32
BS = B * S
N_HEADS = 4
HEAD_DIM = H // N_HEADS
PF = 64
EPS = 1e-12          # LayerNorm variance_epsilon (added to std in the PyTorch code)

# ---- weight-slab layout (bf16, 128 lanes, section offsets are multiples of 16) ----
SLAB_W = 128
R_WQKV = 0            # rows   0: 32  -> [wq | wk | wv | 0]          (32, 128)
R_WO   = 32           # rows  32: 64  -> [wo | 0]                    (32, 128)
R_W1   = 64           # rows  64: 96  -> [w1 | 0]                    (32, 128)
R_W2   = 96           # rows  96:160  -> [w2 | 0]                    (64, 128)
R_VEC  = 160          # rows 160:168  -> bqkv, bo, b1, b2, g1, be1, g2, be2 (8, 128)
SLAB_ROWS = 176       # padded to a multiple of 16


def encoder_layer_kernel(x_ref, slab_ref, out_ref):
    x = x_ref[...]                                                    # (BS, H) f32
    x_b = x.astype(jnp.bfloat16)

    # ---- unpack the slab: static sublane slices (offsets % 16 == 0), lane offset 0 ----
    wqkv = slab_ref[R_WQKV:R_WQKV + H, :]                             # (H, 128) bf16
    wo   = slab_ref[R_WO:R_WO + H, 0:H]                               # (H, H)   bf16
    w1   = slab_ref[R_W1:R_W1 + H, 0:PF]                              # (H, PF)  bf16
    w2   = slab_ref[R_W2:R_W2 + PF, 0:H]                              # (PF, H)  bf16
    vec  = slab_ref[R_VEC:R_VEC + 8, :].astype(jnp.float32)           # (8, 128) f32

    bqkv = vec[0:1, :]                                                # (1, 128)
    bo   = vec[1:2, 0:H]
    b1   = vec[2:3, 0:PF]
    b2   = vec[3:4, 0:H]
    g1   = vec[4:5, 0:H]
    be1  = vec[5:6, 0:H]
    g2   = vec[6:7, 0:H]
    be2  = vec[7:8, 0:H]

    # ---- fused Q|K|V projection: one lane-dense bf16 MXU matmul, f32 accumulate ----
    qkv = jnp.dot(x_b, wqkv, preferred_element_type=jnp.float32) + bqkv   # (BS, 128)
    q = qkv[:, 0:H]
    k = qkv[:, H:2 * H]
    v = qkv[:, 2 * H:3 * H]

    inv_scale = 1.0 / (float(HEAD_DIM) ** 0.5)
    inv_h = 1.0 / H
    inv_hm1 = 1.0 / (H - 1)

    # ---- multi-head self-attention (per-head static unroll, 3-D einsums, f32) ----
    heads = []
    for h in range(N_HEADS):
        lo = h * HEAD_DIM
        qh = q[:, lo:lo + HEAD_DIM].reshape(B, S, HEAD_DIM)
        kh = k[:, lo:lo + HEAD_DIM].reshape(B, S, HEAD_DIM)
        vh = v[:, lo:lo + HEAD_DIM].reshape(B, S, HEAD_DIM)

        energy = jnp.einsum('bqd,bkd->bqk', qh, kh,
                            preferred_element_type=jnp.float32) * inv_scale  # (B,S,S)
        energy = energy - jnp.max(energy, axis=-1, keepdims=True)
        p = jnp.exp(energy)
        p = p * pl.reciprocal(jnp.sum(p, axis=-1, keepdims=True), approx=True)

        oh = jnp.einsum('bqk,bkd->bqd', p, vh,
                        preferred_element_type=jnp.float32)
        heads.append(oh.reshape(BS, HEAD_DIM))

    # single output projection: concat_h(o_h) @ Wo (1 MXU push instead of 4)
    o_cat = jnp.concatenate(heads, axis=-1)                           # (BS, H)
    o = jnp.dot(o_cat.astype(jnp.bfloat16), wo,
                preferred_element_type=jnp.float32) + bo

    # ---- residual + LayerNorm 1 (torch: (x-mean)/(std+eps), unbiased std) ----
    y = x + o
    mean1 = jnp.sum(y, axis=-1, keepdims=True) * inv_h
    d1 = y - mean1
    var1 = jnp.sum(d1 * d1, axis=-1, keepdims=True) * inv_hm1
    y = g1 * (d1 * lax.rsqrt(var1)) + be1

    # ---- positionwise feedforward (Conv1d k=1 == Linear over hid dim), bf16 MXU ----
    h1 = jnp.maximum(
        jnp.dot(y.astype(jnp.bfloat16), w1, preferred_element_type=jnp.float32) + b1,
        0.0)
    h2 = jnp.dot(h1.astype(jnp.bfloat16), w2,
                 preferred_element_type=jnp.float32) + b2

    # ---- residual + LayerNorm 2 ----
    z = y + h2
    mean2 = jnp.sum(z, axis=-1, keepdims=True) * inv_h
    d2 = z - mean2
    var2 = jnp.sum(d2 * d2, axis=-1, keepdims=True) * inv_hm1
    out_ref[...] = g2 * (d2 * lax.rsqrt(var2)) + be2


def fuse_params(p):
    """One-time layout plumbing: pack ALL parameters into a single sublane-stacked
    bf16 (176, 128) slab so the kernel sees exactly two inputs (x + slab)."""
    def pad_lanes(a):
        return jnp.pad(a, ((0, 0), (0, SLAB_W - a.shape[1])))

    wqkv = pad_lanes(jnp.concatenate([p["wq"], p["wk"], p["wv"]], axis=1))  # (32,128)
    wo   = pad_lanes(p["wo"])                                               # (32,128)
    w1   = pad_lanes(p["w1"])                                               # (32,128)
    w2   = pad_lanes(p["w2"])                                               # (64,128)
    bqkv = pad_lanes(jnp.concatenate([p["bq"], p["bk"], p["bv"]], axis=1))  # (1,128)
    vec = jnp.concatenate(
        [bqkv,
         pad_lanes(p["bo"]), pad_lanes(p["b1"]), pad_lanes(p["b2"]),
         pad_lanes(p["gamma1"]), pad_lanes(p["beta1"]),
         pad_lanes(p["gamma2"]), pad_lanes(p["beta2"])], axis=0)            # (8,128)

    slab = jnp.concatenate([wqkv, wo, w1, w2, vec], axis=0)                 # (168,128)
    slab = jnp.pad(slab, ((0, SLAB_ROWS - slab.shape[0]), (0, 0)))          # (176,128)
    return slab.astype(jnp.bfloat16)


def encoder_layer(trg, slab):
    """trg: (B, S, H) float32; slab: fused bf16 weight slab from fuse_params()."""
    x2d = trg.reshape(BS, H)   # fold batch into sublanes; single grid point, one TC
    out2d = pl.pallas_call(
        encoder_layer_kernel,
        out_shape=jax.ShapeDtypeStruct((BS, H), jnp.float32),
    )(x2d, slab)
    return out2d.reshape(B, S, H)


def reference_encoder_layer(trg, p):
    """Pure-JAX f32 reference matching the PyTorch forward (eval mode)."""
    x = trg
    q = x @ p["wq"] + p["bq"]
    k = x @ p["wk"] + p["bk"]
    v = x @ p["wv"] + p["bv"]

    def split(t):  # (B,S,H) -> (B,nh,S,hd)
        return t.reshape(B, S, N_HEADS, HEAD_DIM).transpose(0, 2, 1, 3)

    qh, kh, vh = split(q), split(k), split(v)
    energy = jnp.einsum("bhqd,bhkd->bhqk", qh, kh) / jnp.sqrt(jnp.float32(HEAD_DIM))
    attn = jax.nn.softmax(energy, axis=-1)
    o = jnp.einsum("bhqk,bhkd->bhqd", attn, vh).transpose(0, 2, 1, 3).reshape(B, S, H)
    o = o @ p["wo"] + p["bo"]

    def ln(t, g, b):
        mean = jnp.mean(t, axis=-1, keepdims=True)
        std = jnp.sqrt(jnp.sum((t - mean) ** 2, axis=-1, keepdims=True) / (H - 1))
        return g * (t - mean) / (std + EPS) + b

    y = ln(x + o, p["gamma1"], p["beta1"])
    h1 = jnp.maximum(y @ p["w1"] + p["b1"], 0.0)
    h2 = h1 @ p["w2"] + p["b2"]
    return ln(y + h2, p["gamma2"], p["beta2"])


def make_params(key):
    keys = jax.random.split(key, 12)
    s = 0.02
    params = {
        # Linear weights stored pre-transposed: (in, out)
        "wq": jax.random.normal(keys[0], (H, H), jnp.float32) * s,
        "bq": jax.random.normal(keys[1], (1, H), jnp.float32) * s,
        "wk": jax.random.normal(keys[2], (H, H), jnp.float32) * s,
        "bk": jax.random.normal(keys[3], (1, H), jnp.float32) * s,
        "wv": jax.random.normal(keys[4], (H, H), jnp.float32) * s,
        "bv": jax.random.normal(keys[5], (1, H), jnp.float32) * s,
        "wo": jax.random.normal(keys[6], (H, H), jnp.float32) * s,
        "bo": jax.random.normal(keys[7], (1, H), jnp.float32) * s,
        # Conv1d(hid->pf, k=1) weight (pf, hid, 1) -> squeezed & transposed -> (hid, pf)
        "w1": jax.random.normal(keys[8], (H, PF), jnp.float32) * s,
        "b1": jax.random.normal(keys[9], (1, PF), jnp.float32) * s,
        "w2": jax.random.normal(keys[10], (PF, H), jnp.float32) * s,
        "b2": jax.random.normal(keys[11], (1, H), jnp.float32) * s,
        # LayerNorm params: gamma=1, beta=0 (as in module init)
        "gamma1": jnp.ones((1, H), jnp.float32),
        "beta1": jnp.zeros((1, H), jnp.float32),
        "gamma2": jnp.ones((1, H), jnp.float32),
        "beta2": jnp.zeros((1, H), jnp.float32),
    }
    return params


if __name__ == "__main__":
    root = jax.random.PRNGKey(0)
    k_x, k_p = jax.random.split(root)
    trg = jax.random.normal(k_x, (B, S, H), jnp.float32)
    params = make_params(k_p)
    slab = fuse_params(params)

    out = encoder_layer(trg, slab)
    out = jax.block_until_ready(out)

    ref = reference_encoder_layer(trg, params)
    # tolerance covers bf16 MXU operands, the EUP approx softmax reciprocal,
    # and rsqrt(var) vs (std + 1e-12) in the LayerNorms
    np.testing.assert_allclose(np.asarray(out), np.asarray(ref), rtol=2e-2, atol=2e-2)

    print("KERNEL_OK")
</pallas_src>

<mosaic_0001>
module attributes {stable_mosaic.version = 11 : i64} {
  func.func @encoder_layer_kernel(%arg0: memref<16x32xf32, #tpu.memory_space<vmem>>, %arg1: memref<176x128xbf16, #tpu.memory_space<vmem>>, %arg2: memref<16x32xf32, #tpu.memory_space<vmem>>) attributes {dimension_semantics = [], scalar_prefetch = 0 : i64, scratch_operands = 0 : i64, tpu.core_type = #tpu.core_type<tc>} {
    %c0 = arith.constant 0 : index
    %c0_0 = arith.constant 0 : index
    %0 = vector.load %arg0[%c0, %c0_0] : memref<16x32xf32, #tpu.memory_space<vmem>>, vector<16x32xf32>
    %1 = arith.truncf %0 : vector<16x32xf32> to vector<16x32xbf16>
    %c0_1 = arith.constant 0 : index
    %c0_2 = arith.constant 0 : index
    %2 = vector.load %arg1[%c0_1, %c0_2] : memref<176x128xbf16, #tpu.memory_space<vmem>>, vector<32x128xbf16>
    %c32 = arith.constant 32 : index
    %c0_3 = arith.constant 0 : index
    %3 = vector.load %arg1[%c32, %c0_3] : memref<176x128xbf16, #tpu.memory_space<vmem>>, vector<32x32xbf16>
    %c64 = arith.constant 64 : index
    %c0_4 = arith.constant 0 : index
    %4 = vector.load %arg1[%c64, %c0_4] : memref<176x128xbf16, #tpu.memory_space<vmem>>, vector<32x64xbf16>
    %c96 = arith.constant 96 : index
    %c0_5 = arith.constant 0 : index
    %5 = vector.load %arg1[%c96, %c0_5] : memref<176x128xbf16, #tpu.memory_space<vmem>>, vector<64x32xbf16>
    %c160 = arith.constant 160 : index
    %c0_6 = arith.constant 0 : index
    %6 = vector.load %arg1[%c160, %c0_6] : memref<176x128xbf16, #tpu.memory_space<vmem>>, vector<8x128xbf16>
    %7 = arith.extf %6 : vector<8x128xbf16> to vector<8x128xf32>
    %8 = vector.extract_strided_slice %7 {offsets = [0, 0], sizes = [1, 128], strides = [1, 1]} : vector<8x128xf32> to vector<1x128xf32>
    %9 = vector.extract_strided_slice %7 {offsets = [1, 0], sizes = [1, 32], strides = [1, 1]} : vector<8x128xf32> to vector<1x32xf32>
    %10 = vector.extract_strided_slice %7 {offsets = [2, 0], sizes = [1, 64], strides = [1, 1]} : vector<8x128xf32> to vector<1x64xf32>
    %11 = vector.extract_strided_slice %7 {offsets = [3, 0], sizes = [1, 32], strides = [1, 1]} : vector<8x128xf32> to vector<1x32xf32>
    %12 = vector.extract_strided_slice %7 {offsets = [4, 0], sizes = [1, 32], strides = [1, 1]} : vector<8x128xf32> to vector<1x32xf32>
    %13 = vector.extract_strided_slice %7 {offsets = [5, 0], sizes = [1, 32], strides = [1, 1]} : vector<8x128xf32> to vector<1x32xf32>
    %14 = vector.extract_strided_slice %7 {offsets = [6, 0], sizes = [1, 32], strides = [1, 1]} : vector<8x128xf32> to vector<1x32xf32>
    %15 = vector.extract_strided_slice %7 {offsets = [7, 0], sizes = [1, 32], strides = [1, 1]} : vector<8x128xf32> to vector<1x32xf32>
    %cst = arith.constant dense<0.000000e+00> : vector<16x128xf32>
    %16 = tpu.matmul %1, %2, %cst {dimension_numbers = #tpu.dot_dimension_numbers<[1], [0], [0], [1], [0, 0, 1, 1], [], []>} : vector<16x32xbf16>, vector<32x128xbf16>, vector<16x128xf32> -> vector<16x128xf32>
    %17 = vector.broadcast %8 : vector<1x128xf32> to vector<16x128xf32>
    %18 = arith.addf %16, %17 : vector<16x128xf32>
    %19 = vector.extract_strided_slice %18 {offsets = [0, 0], sizes = [16, 32], strides = [1, 1]} : vector<16x128xf32> to vector<16x32xf32>
    %20 = vector.extract_strided_slice %18 {offsets = [0, 32], sizes = [16, 32], strides = [1, 1]} : vector<16x128xf32> to vector<16x32xf32>
    %21 = vector.extract_strided_slice %18 {offsets = [0, 64], sizes = [16, 32], strides = [1, 1]} : vector<16x128xf32> to vector<16x32xf32>
    %22 = vector.extract_strided_slice %19 {offsets = [0, 0], sizes = [16, 8], strides = [1, 1]} : vector<16x32xf32> to vector<16x8xf32>
    %23 = vector.shape_cast %22 : vector<16x8xf32> to vector<2x8x8xf32>
    %24 = vector.extract_strided_slice %20 {offsets = [0, 0], sizes = [16, 8], strides = [1, 1]} : vector<16x32xf32> to vector<16x8xf32>
    %25 = vector.shape_cast %24 : vector<16x8xf32> to vector<2x8x8xf32>
    %26 = vector.extract_strided_slice %21 {offsets = [0, 0], sizes = [16, 8], strides = [1, 1]} : vector<16x32xf32> to vector<16x8xf32>
    %27 = vector.shape_cast %26 : vector<16x8xf32> to vector<2x8x8xf32>
    "tpu.trace_start"() <{level = 10 : i32, message = "bqd,bkd->bqk"}> : () -> ()
    %cst_7 = arith.constant dense<0.000000e+00> : vector<2x8x8xf32>
    %28 = tpu.matmul %23, %25, %cst_7 {dimension_numbers = #tpu.dot_dimension_numbers<[2], [2], [1], [1], [0, 0, 0, 1, 1, 1], [0], [0]>} : vector<2x8x8xf32>, vector<2x8x8xf32>, vector<2x8x8xf32> -> vector<2x8x8xf32>
    "tpu.trace_stop"() : () -> ()
    %cst_8 = arith.constant 0.353553385 : f32
    %29 = vector.broadcast %cst_8 : f32 to vector<2x8x8xf32>
    %30 = arith.mulf %28, %29 : vector<2x8x8xf32>
    %cst_9 = arith.constant dense<0xFF800000> : vector<2x8xf32>
    %31 = vector.multi_reduction <maximumf>, %30, %cst_9 [2] : vector<2x8x8xf32> to vector<2x8xf32>
    %32 = vector.shape_cast %31 : vector<2x8xf32> to vector<2x8x1xf32>
    %33 = vector.broadcast %32 : vector<2x8x1xf32> to vector<2x8x8xf32>
    %34 = arith.subf %30, %33 : vector<2x8x8xf32>
    %35 = math.exp %34 : vector<2x8x8xf32>
    %cst_10 = arith.constant dense<0.000000e+00> : vector<2x8xf32>
    %36 = vector.multi_reduction <add>, %35, %cst_10 [2] : vector<2x8x8xf32> to vector<2x8xf32>
    %37 = vector.shape_cast %36 : vector<2x8xf32> to vector<2x8x1xf32>
    %38 = tpu.reciprocal %37 {approx = true} : vector<2x8x1xf32> -> vector<2x8x1xf32>
    %39 = vector.broadcast %38 : vector<2x8x1xf32> to vector<2x8x8xf32>
    %40 = arith.mulf %35, %39 : vector<2x8x8xf32>
    "tpu.trace_start"() <{level = 10 : i32, message = "bqk,bkd->bqd"}> : () -> ()
    %cst_11 = arith.constant dense<0.000000e+00> : vector<2x8x8xf32>
    %41 = tpu.matmul %40, %27, %cst_11 {dimension_numbers = #tpu.dot_dimension_numbers<[2], [1], [1], [2], [0, 0, 0, 1, 1, 2], [0], [0]>} : vector<2x8x8xf32>, vector<2x8x8xf32>, vector<2x8x8xf32> -> vector<2x8x8xf32>
    "tpu.trace_stop"() : () -> ()
    %42 = vector.shape_cast %41 : vector<2x8x8xf32> to vector<16x8xf32>
    %43 = vector.extract_strided_slice %19 {offsets = [0, 8], sizes = [16, 8], strides = [1, 1]} : vector<16x32xf32> to vector<16x8xf32>
    %44 = vector.shape_cast %43 : vector<16x8xf32> to vector<2x8x8xf32>
    %45 = vector.extract_strided_slice %20 {offsets = [0, 8], sizes = [16, 8], strides = [1, 1]} : vector<16x32xf32> to vector<16x8xf32>
    %46 = vector.shape_cast %45 : vector<16x8xf32> to vector<2x8x8xf32>
    %47 = vector.extract_strided_slice %21 {offsets = [0, 8], sizes = [16, 8], strides = [1, 1]} : vector<16x32xf32> to vector<16x8xf32>
    %48 = vector.shape_cast %47 : vector<16x8xf32> to vector<2x8x8xf32>
    "tpu.trace_start"() <{level = 10 : i32, message = "bqd,bkd->bqk"}> : () -> ()
    %cst_12 = arith.constant dense<0.000000e+00> : vector<2x8x8xf32>
    %49 = tpu.matmul %44, %46, %cst_12 {dimension_numbers = #tpu.dot_dimension_numbers<[2], [2], [1], [1], [0, 0, 0, 1, 1, 1], [0], [0]>} : vector<2x8x8xf32>, vector<2x8x8xf32>, vector<2x8x8xf32> -> vector<2x8x8xf32>
    "tpu.trace_stop"() : () -> ()
    %cst_13 = arith.constant 0.353553385 : f32
    %50 = vector.broadcast %cst_13 : f32 to vector<2x8x8xf32>
    %51 = arith.mulf %49, %50 : vector<2x8x8xf32>
    %cst_14 = arith.constant dense<0xFF800000> : vector<2x8xf32>
    %52 = vector.multi_reduction <maximumf>, %51, %cst_14 [2] : vector<2x8x8xf32> to vector<2x8xf32>
    %53 = vector.shape_cast %52 : vector<2x8xf32> to vector<2x8x1xf32>
    %54 = vector.broadcast %53 : vector<2x8x1xf32> to vector<2x8x8xf32>
    %55 = arith.subf %51, %54 : vector<2x8x8xf32>
    %56 = math.exp %55 : vector<2x8x8xf32>
    %cst_15 = arith.constant dense<0.000000e+00> : vector<2x8xf32>
    %57 = vector.multi_reduction <add>, %56, %cst_15 [2] : vector<2x8x8xf32> to vector<2x8xf32>
    %58 = vector.shape_cast %57 : vector<2x8xf32> to vector<2x8x1xf32>
    %59 = tpu.reciprocal %58 {approx = true} : vector<2x8x1xf32> -> vector<2x8x1xf32>
    %60 = vector.broadcast %59 : vector<2x8x1xf32> to vector<2x8x8xf32>
    %61 = arith.mulf %56, %60 : vector<2x8x8xf32>
    "tpu.trace_start"() <{level = 10 : i32, message = "bqk,bkd->bqd"}> : () -> ()
    %cst_16 = arith.constant dense<0.000000e+00> : vector<2x8x8xf32>
    %62 = tpu.matmul %61, %48, %cst_16 {dimension_numbers = #tpu.dot_dimension_numbers<[2], [1], [1], [2], [0, 0, 0, 1, 1, 2], [0], [0]>} : vector<2x8x8xf32>, vector<2x8x8xf32>, vector<2x8x8xf32> -> vector<2x8x8xf32>
    "tpu.trace_stop"() : () -> ()
    %63 = vector.shape_cast %62 : vector<2x8x8xf32> to vector<16x8xf32>
    %64 = vector.extract_strided_slice %19 {offsets = [0, 16], sizes = [16, 8], strides = [1, 1]} : vector<16x32xf32> to vector<16x8xf32>
    %65 = vector.shape_cast %64 : vector<16x8xf32> to vector<2x8x8xf32>
    %66 = vector.extract_strided_slice %20 {offsets = [0, 16], sizes = [16, 8], strides = [1, 1]} : vector<16x32xf32> to vector<16x8xf32>
    %67 = vector.shape_cast %66 : vector<16x8xf32> to vector<2x8x8xf32>
    %68 = vector.extract_strided_slice %21 {offsets = [0, 16], sizes = [16, 8], strides = [1, 1]} : vector<16x32xf32> to vector<16x8xf32>
    %69 = vector.shape_cast %68 : vector<16x8xf32> to vector<2x8x8xf32>
    "tpu.trace_start"() <{level = 10 : i32, message = "bqd,bkd->bqk"}> : () -> ()
    %cst_17 = arith.constant dense<0.000000e+00> : vector<2x8x8xf32>
    %70 = tpu.matmul %65, %67, %cst_17 {dimension_numbers = #tpu.dot_dimension_numbers<[2], [2], [1], [1], [0, 0, 0, 1, 1, 1], [0], [0]>} : vector<2x8x8xf32>, vector<2x8x8xf32>, vector<2x8x8xf32> -> vector<2x8x8xf32>
    "tpu.trace_stop"() : () -> ()
    %cst_18 = arith.constant 0.353553385 : f32
    %71 = vector.broadcast %cst_18 : f32 to vector<2x8x8xf32>
    %72 = arith.mulf %70, %71 : vector<2x8x8xf32>
    %cst_19 = arith.constant dense<0xFF800000> : vector<2x8xf32>
    %73 = vector.multi_reduction <maximumf>, %72, %cst_19 [2] : vector<2x8x8xf32> to vector<2x8xf32>
    %74 = vector.shape_cast %73 : vector<2x8xf32> to vector<2x8x1xf32>
    %75 = vector.broadcast %74 : vector<2x8x1xf32> to vector<2x8x8xf32>
    %76 = arith.subf %72, %75 : vector<2x8x8xf32>
    %77 = math.exp %76 : vector<2x8x8xf32>
    %cst_20 = arith.constant dense<0.000000e+00> : vector<2x8xf32>
    %78 = vector.multi_reduction <add>, %77, %cst_20 [2] : vector<2x8x8xf32> to vector<2x8xf32>
    %79 = vector.shape_cast %78 : vector<2x8xf32> to vector<2x8x1xf32>
    %80 = tpu.reciprocal %79 {approx = true} : vector<2x8x1xf32> -> vector<2x8x1xf32>
    %81 = vector.broadcast %80 : vector<2x8x1xf32> to vector<2x8x8xf32>
    %82 = arith.mulf %77, %81 : vector<2x8x8xf32>
    "tpu.trace_start"() <{level = 10 : i32, message = "bqk,bkd->bqd"}> : () -> ()
    %cst_21 = arith.constant dense<0.000000e+00> : vector<2x8x8xf32>
    %83 = tpu.matmul %82, %69, %cst_21 {dimension_numbers = #tpu.dot_dimension_numbers<[2], [1], [1], [2], [0, 0, 0, 1, 1, 2], [0], [0]>} : vector<2x8x8xf32>, vector<2x8x8xf32>, vector<2x8x8xf32> -> vector<2x8x8xf32>
    "tpu.trace_stop"() : () -> ()
    %84 = vector.shape_cast %83 : vector<2x8x8xf32> to vector<16x8xf32>
    %85 = vector.extract_strided_slice %19 {offsets = [0, 24], sizes = [16, 8], strides = [1, 1]} : vector<16x32xf32> to vector<16x8xf32>
    %86 = vector.shape_cast %85 : vector<16x8xf32> to vector<2x8x8xf32>
    %87 = vector.extract_strided_slice %20 {offsets = [0, 24], sizes = [16, 8], strides = [1, 1]} : vector<16x32xf32> to vector<16x8xf32>
    %88 = vector.shape_cast %87 : vector<16x8xf32> to vector<2x8x8xf32>
    %89 = vector.extract_strided_slice %21 {offsets = [0, 24], sizes = [16, 8], strides = [1, 1]} : vector<16x32xf32> to vector<16x8xf32>
    %90 = vector.shape_cast %89 : vector<16x8xf32> to vector<2x8x8xf32>
    "tpu.trace_start"() <{level = 10 : i32, message = "bqd,bkd->bqk"}> : () -> ()
    %cst_22 = arith.constant dense<0.000000e+00> : vector<2x8x8xf32>
    %91 = tpu.matmul %86, %88, %cst_22 {dimension_numbers = #tpu.dot_dimension_numbers<[2], [2], [1], [1], [0, 0, 0, 1, 1, 1], [0], [0]>} : vector<2x8x8xf32>, vector<2x8x8xf32>, vector<2x8x8xf32> -> vector<2x8x8xf32>
    "tpu.trace_stop"() : () -> ()
    %cst_23 = arith.constant 0.353553385 : f32
    %92 = vector.broadcast %cst_23 : f32 to vector<2x8x8xf32>
    %93 = arith.mulf %91, %92 : vector<2x8x8xf32>
    %cst_24 = arith.constant dense<0xFF800000> : vector<2x8xf32>
    %94 = vector.multi_reduction <maximumf>, %93, %cst_24 [2] : vector<2x8x8xf32> to vector<2x8xf32>
    %95 = vector.shape_cast %94 : vector<2x8xf32> to vector<2x8x1xf32>
    %96 = vector.broadcast %95 : vector<2x8x1xf32> to vector<2x8x8xf32>
    %97 = arith.subf %93, %96 : vector<2x8x8xf32>
    %98 = math.exp %97 : vector<2x8x8xf32>
    %cst_25 = arith.constant dense<0.000000e+00> : vector<2x8xf32>
    %99 = vector.multi_reduction <add>, %98, %cst_25 [2] : vector<2x8x8xf32> to vector<2x8xf32>
    %100 = vector.shape_cast %99 : vector<2x8xf32> to vector<2x8x1xf32>
    %101 = tpu.reciprocal %100 {approx = true} : vector<2x8x1xf32> -> vector<2x8x1xf32>
    %102 = vector.broadcast %101 : vector<2x8x1xf32> to vector<2x8x8xf32>
    %103 = arith.mulf %98, %102 : vector<2x8x8xf32>
    "tpu.trace_start"() <{level = 10 : i32, message = "bqk,bkd->bqd"}> : () -> ()
    %cst_26 = arith.constant dense<0.000000e+00> : vector<2x8x8xf32>
    %104 = tpu.matmul %103, %90, %cst_26 {dimension_numbers = #tpu.dot_dimension_numbers<[2], [1], [1], [2], [0, 0, 0, 1, 1, 2], [0], [0]>} : vector<2x8x8xf32>, vector<2x8x8xf32>, vector<2x8x8xf32> -> vector<2x8x8xf32>
    "tpu.trace_stop"() : () -> ()
    %105 = vector.shape_cast %104 : vector<2x8x8xf32> to vector<16x8xf32>
    %106 = tpu.concatenate %42, %63, %84, %105 in 1 : vector<16x8xf32>, vector<16x8xf32>, vector<16x8xf32>, vector<16x8xf32> -> vector<16x32xf32>
    %107 = arith.truncf %106 : vector<16x32xf32> to vector<16x32xbf16>
    %cst_27 = arith.constant dense<0.000000e+00> : vector<16x32xf32>
    %108 = tpu.matmul %107, %3, %cst_27 {dimension_numbers = #tpu.dot_dimension_numbers<[1], [0], [0], [1], [0, 0, 1, 1], [], []>} : vector<16x32xbf16>, vector<32x32xbf16>, vector<16x32xf32> -> vector<16x32xf32>
    %109 = vector.broadcast %9 : vector<1x32xf32> to vector<16x32xf32>
    %110 = arith.addf %108, %109 : vector<16x32xf32>
    %111 = arith.addf %0, %110 : vector<16x32xf32>
    %cst_28 = arith.constant dense<0.000000e+00> : vector<16xf32>
    %112 = vector.multi_reduction <add>, %111, %cst_28 [1] : vector<16x32xf32> to vector<16xf32>
    %113 = vector.shape_cast %112 : vector<16xf32> to vector<16x1xf32>
    %cst_29 = arith.constant 3.125000e-02 : f32
    %114 = vector.broadcast %cst_29 : f32 to vector<16x1xf32>
    %115 = arith.mulf %113, %114 : vector<16x1xf32>
    %116 = vector.broadcast %115 : vector<16x1xf32> to vector<16x32xf32>
    %117 = arith.subf %111, %116 : vector<16x32xf32>
    %118 = arith.mulf %117, %117 : vector<16x32xf32>
    %cst_30 = arith.constant dense<0.000000e+00> : vector<16xf32>
    %119 = vector.multi_reduction <add>, %118, %cst_30 [1] : vector<16x32xf32> to vector<16xf32>
    %120 = vector.shape_cast %119 : vector<16xf32> to vector<16x1xf32>
    %cst_31 = arith.constant 0.0322580636 : f32
    %121 = vector.broadcast %cst_31 : f32 to vector<16x1xf32>
    %122 = arith.mulf %120, %121 : vector<16x1xf32>
    %123 = math.rsqrt %122 : vector<16x1xf32>
    %124 = vector.broadcast %123 : vector<16x1xf32> to vector<16x32xf32>
    %125 = arith.mulf %117, %124 : vector<16x32xf32>
    %126 = vector.broadcast %12 : vector<1x32xf32> to vector<16x32xf32>
    %127 = arith.mulf %126, %125 : vector<16x32xf32>
    %128 = vector.broadcast %13 : vector<1x32xf32> to vector<16x32xf32>
    %129 = arith.addf %127, %128 : vector<16x32xf32>
    %130 = arith.truncf %129 : vector<16x32xf32> to vector<16x32xbf16>
    %cst_32 = arith.constant dense<0.000000e+00> : vector<16x64xf32>
    %131 = tpu.matmul %130, %4, %cst_32 {dimension_numbers = #tpu.dot_dimension_numbers<[1], [0], [0], [1], [0, 0, 1, 1], [], []>} : vector<16x32xbf16>, vector<32x64xbf16>, vector<16x64xf32> -> vector<16x64xf32>
    %132 = vector.broadcast %10 : vector<1x64xf32> to vector<16x64xf32>
    %133 = arith.addf %131, %132 : vector<16x64xf32>
    %cst_33 = arith.constant 0.000000e+00 : f32
    %134 = vector.broadcast %cst_33 : f32 to vector<16x64xf32>
    %135 = arith.maximumf %133, %134 : vector<16x64xf32>
    %136 = arith.truncf %135 : vector<16x64xf32> to vector<16x64xbf16>
    %cst_34 = arith.constant dense<0.000000e+00> : vector<16x32xf32>
    %137 = tpu.matmul %136, %5, %cst_34 {dimension_numbers = #tpu.dot_dimension_numbers<[1], [0], [0], [1], [0, 0, 1, 1], [], []>} : vector<16x64xbf16>, vector<64x32xbf16>, vector<16x32xf32> -> vector<16x32xf32>
    %138 = vector.broadcast %11 : vector<1x32xf32> to vector<16x32xf32>
    %139 = arith.addf %137, %138 : vector<16x32xf32>
    %140 = arith.addf %129, %139 : vector<16x32xf32>
    %cst_35 = arith.constant dense<0.000000e+00> : vector<16xf32>
    %141 = vector.multi_reduction <add>, %140, %cst_35 [1] : vector<16x32xf32> to vector<16xf32>
    %142 = vector.shape_cast %141 : vector<16xf32> to vector<16x1xf32>
    %cst_36 = arith.constant 3.125000e-02 : f32
    %143 = vector.broadcast %cst_36 : f32 to vector<16x1xf32>
    %144 = arith.mulf %142, %143 : vector<16x1xf32>
    %145 = vector.broadcast %144 : vector<16x1xf32> to vector<16x32xf32>
    %146 = arith.subf %140, %145 : vector<16x32xf32>
    %147 = arith.mulf %146, %146 : vector<16x32xf32>
    %cst_37 = arith.constant dense<0.000000e+00> : vector<16xf32>
    %148 = vector.multi_reduction <add>, %147, %cst_37 [1] : vector<16x32xf32> to vector<16xf32>
    %149 = vector.shape_cast %148 : vector<16xf32> to vector<16x1xf32>
    %cst_38 = arith.constant 0.0322580636 : f32
    %150 = vector.broadcast %cst_38 : f32 to vector<16x1xf32>
    %151 = arith.mulf %149, %150 : vector<16x1xf32>
    %152 = math.rsqrt %151 : vector<16x1xf32>
    %153 = vector.broadcast %152 : vector<16x1xf32> to vector<16x32xf32>
    %154 = arith.mulf %146, %153 : vector<16x32xf32>
    %155 = vector.broadcast %14 : vector<1x32xf32> to vector<16x32xf32>
    %156 = arith.mulf %155, %154 : vector<16x32xf32>
    %157 = vector.broadcast %15 : vector<1x32xf32> to vector<16x32xf32>
    %158 = arith.addf %156, %157 : vector<16x32xf32>
    %c0_39 = arith.constant 0 : index
    %c0_40 = arith.constant 0 : index
    %159 = vector.load %arg2[%c0_39, %c0_40] : memref<16x32xf32, #tpu.memory_space<vmem>>, vector<16x32xf32>
    tpu.vector_store %arg2[%c0_39, %c0_40], %158 {strides = array<i32>} : memref<16x32xf32, #tpu.memory_space<vmem>>, vector<16x32xf32>,
    return
  }
}

</mosaic_0001>

<bundles_post_ra>
// kernel: tpu_custom_call.1
= control target key start
LH: loop header
LB: loop body
LE: loop exit
PB: predicated region body
PF: predicated region fallthrough
CT: control target
= control target key end

     0   :  { %7 = vsyncpa [#allocation3], 0  ;;  %s1298_s0 = inlined_call_operand.hbm [shape: f32[16,32], index: 0, kind: input, shape index: {}]   ;;  %s1299_s1 = inlined_call_operand.hbm [shape: bf16[176,128], index: 1, kind: input, shape index: {}]   ;;  %s1300_s2 = inlined_call_operand.hbm [shape: f32[16,32], index: 2, kind: output, shape index: {}]  }
   0x1   :  { %8 = vsyncpa [#allocation6], 0 }
   0x2   :  { %9 = vsyncpa [#allocation4], 0  ;;  %s14_s11 = sshll.u32 %s1298_s0, 4  ;;  %s1130_s12 = smov [#allocation2]   ;;  %s15_s11 = int_to_ptr.hbm [resolvable:$true] %s14_s11 }
   0x3   :  { %s16_s13 = sshll.u32 %s1130_s12, 4  ;;  %s27_s16 = sshll.u32 %s1299_s1, 4  ;;  %s17_s13 = int_to_ptr.vmem [resolvable:$true] %s16_s13  ;;  %s28_s16 = int_to_ptr.hbm [resolvable:$true] %s27_s16 }
   0x4   :  { %s1131_s17 = smov 128   ;;  %s1132_s18 = smov 8  }
   0x5   :  { %22 = dma.hbm_to_vmem [thread:$0]  %s15_s11, 256, %s17_s13, [#allocation3], %s1131_s17, %s1131_s17, %s1132_s18  }
   0x6   :  { %s1133_s19 = smov [#allocation5]   ;;  %s1134_s21 = smov 64  }
   0x7   :  { %s29_s20 = sshll.u32 %s1133_s19, 4  ;;  %s1135_s0 = smov 4   ;;  %s30_s20 = int_to_ptr.vmem [resolvable:$true] %s29_s20 }
   0x8   :  { %35 = dma.hbm_to_vmem [thread:$0]  %s28_s16, 1408, %s30_s20, [#allocation6], %s1134_s21, %s1134_s21, %s1135_s0  }
   0x9   :  { %1124 = dma.done.wait [#allocation3], 256  }
   0xa   :  { %1125 = vsyncadd [#allocation3], 4294967040 }
   0xb   :  { %1126 = dma.done.wait [#allocation6], 1408  }
   0xc   :  { %1127 = vsyncadd [#allocation6], 4294965888  ;;  %v959_v0 = vld [vmem:[#allocation5 + $0x8] sm:$0xff]  ;;  %v958_v1 = vld [vmem:[#allocation5] sm:$0xff]  ;;  %vm83_vm0 = vcmask 261120   ;;  %s1136_s1 = smov 96  }
   0xd   :  { %93 = vmatpush.bf16.msra.mxu0 %v959_v0  ;;  %v1175_v2 = vld [vmem:[#allocation2] sm:$0xff]  ;;  %v1177_v3 = vld [vmem:[#allocation2 + $0x8] sm:$0xff]  ;;  %s1137_s22 = smov 88   ;;  %s1138_s23 = smov 120   ;;  %vm104_vm1 = vcmask 64512   ;;  %vm654_vm2 = vcmask 130048  }
   0xe   :  { %v47_v4 = vpack.c.bf16 %v1177_v3, %v1175_v2  ;;  %v68_v5 = vld [vmem:[#allocation5 + $0x50] sm:$0xf]  ;;  %s1139_s24 = smov 72   ;;  %s1140_s25 = smov 80   ;;  %vm657_vm3 = vcmask 195584   ;;  %vm800_vm10 = vcmask 523264  }
   0xf   :  { %v1182_v6 = vunpack.c.l.bf16 %v68_v5  ;;  %s1141_s26 = smov 112   ;;  %s1142_s27 = smov 104  }
  0x10   :  { %s1143_s28 = smov 48   ;;  %s1144_s29 = smov 40  }
  0x11   :  { %94 = vmatpush.bf16.msra.mxu0 %v958_v1  ;;  %v70_v7 = vperm.slane %v1182_v6, 0  ;;  %s1145_s30 = smov 56   ;;  %s1146_s3 = smov 16  }
  0x12   :  { %s1147_s4 = smov 24   ;;  %s1148_s5 = smov [#allocation7]  }
  0x13   :  { %s874_s6 = sshll.u32 %s1148_s5, 4  ;;  %s876_s9 = sshll.u32 %s1300_s2, 4  ;;  %s875_s6 = int_to_ptr.vmem [resolvable:$true] %s874_s6  ;;  %s877_s9 = int_to_ptr.hbm [resolvable:$true] %s876_s9 }
  0x14   :  { %898 = vmatmul.msk.bf16.vlgmr.msra.gmra.mxu0 %vm83_vm0, %v47_v4 }
  0x91   :  { %v96_v8 = vpop.f32.mrf.mxu0 }
  0x92   :  { %v1185_v9 = vadd.f32 %v96_v8, %v70_v7 }
  0x94   :  { %180 = vrot.lane.b32.xlu2 %v1185_v9, %s1134_s21  ;;  %102 = vrot.lane.b32.xlu0 %v1185_v9, %s1136_s1 }
  0x99   :  { %v98_v10 = vpop.f32.mrf.mxu0 }
  0x9a   :  { %v1190_v11 = vadd.f32 %v98_v10, %v70_v7 }
  0x9c   :  { %130 = vrot.lane.b32.xlu1 %v1190_v11, %s1136_s1  ;;  %262 = vrot.lane.b32.xlu2 %v1190_v11, %s1137_s22 }
  0xa4   :  { %232 = vrot.lane.b32.xlu1 %v1185_v9, %s1138_s23  ;;  %260 = vrot.lane.b32.xlu2 %v1190_v11, %s1138_s23 }
  0xac   :  { %498 = vrot.lane.b32.xlu1 %v1185_v9, %s1139_s24  ;;  %234 = vrot.lane.b32.xlu2 %v1185_v9, %s1137_s22 }
  0xb4   :  { %394 = vrot.lane.b32.xlu1 %v1190_v11, %s1140_s25  ;;  %366 = vrot.lane.b32.xlu2 %v1185_v9, %s1140_s25 }
  0xbc   :  { %364 = vrot.lane.b32.xlu2 %v1185_v9, %s1141_s26 }
  0xc4   :  { %496 = vrot.lane.b32.xlu2 %v1185_v9, %s1142_s27 }
  0xcc   :  { %526 = vrot.lane.b32.xlu2 %v1190_v11, %s1139_s24 }
  0xee   :  { %v181_v12 = vpop.permute.xlu2 %180 }
  0xf6   :  { %v263_v13 = vpop.permute.xlu2 %262 }
  0xfe   :  { %v261_v14 = vpop.permute.xlu2 %260 }
 0x106   :  { %v235_v15 = vpop.permute.xlu2 %234  ;;  %v103_v16 = vpop.permute.xlu0 %102 }
 0x107   :  { %899 = vmatpush.xpose.msk.msra.mxu1 %vm104_vm1, %v103_v16  ;;  %v992_v16 = vpack.i.bf16 %v1190_v11, %v1185_v9 }
 0x10a   :  { %900 = vmatmul.msk.f32.vlgmr.msra.gmra.mxu1 %vm104_vm1, %v1185_v9 }
 0x10b   :  { %201 = vmatpush.msrb.mxu1 %v181_v12 }
 0x10d   :  { %905 = vmatpush.xpose.msk.msra.mxu1 %vm104_vm1, %v235_v15 }
 0x10e   :  { %v131_v17 = vpop.permute.xlu1 %130  ;;  %v367_v18 = vpop.permute.xlu2 %366 }
 0x10f   :  { %901 = vmatpush.xpose.msk.msra.mxu2 %vm104_vm1, %v131_v17 }
 0x112   :  { %902 = vmatmul.msk.f32.vlgmr.msra.gmra.mxu2 %vm104_vm1, %v1190_v11 }
 0x113   :  { %907 = vmatpush.xpose.msk.msrb.mxu2 %vm104_vm1, %v263_v13 }
 0x116   :  { %v233_v19 = vpop.permute.xlu1 %232  ;;  %v365_v20 = vpop.permute.xlu2 %364 }
 0x117   :  { %911 = vmatpush.xpose.msk.msra.mxu2 %vm104_vm1, %v367_v18 }
 0x11a   :  { %908 = vmatmul.msk.f32.vlgmr.msrb.gmra.mxu2 %vm104_vm1, %v261_v14 }
 0x11e   :  { %v499_v21 = vpop.permute.xlu1 %498  ;;  %v497_v22 = vpop.permute.xlu2 %496 }
 0x11f   :  { %917 = vmatpush.xpose.msk.msrb.mxu2 %vm104_vm1, %v499_v21 }
 0x122   :  { %912 = vmatmul.msk.f32.vlgmr.msra.gmra.mxu2 %vm104_vm1, %v365_v20 }
 0x126   :  { %v395_v23 = vpop.permute.xlu1 %394  ;;  %v527_v24 = vpop.permute.xlu2 %526 }
 0x127   :  { %913 = vmatpush.xpose.msk.msrb.mxu0 %vm104_vm1, %v395_v23 }
 0x12a   :  { %918 = vmatmul.msk.f32.vlgmr.msrb.gmra.mxu2 %vm104_vm1, %v497_v22 }
 0x12b   :  { %919 = vmatpush.xpose.msk.msra.mxu0 %vm104_vm1, %v527_v24 }
 0x187   :  { %v126_v25 = vpop.f32.mrf.mxu1 }
 0x188   :  { %v156_v26 = vmul.f32 0.35355338, %v126_v25 }
 0x18a   :  { %v158_v27 = vsel %vm104_vm1, %v156_v26, -inf }
 0x18b   :  { %159 = vmax.xlane.f32.xlu0 %v158_v27 }
 0x195   :  { %v153_v28 = vpop.f32.mrf.mxu2 }
 0x196   :  { %v157_v29 = vmul.f32 0.35355338, %v153_v28 }
 0x198   :  { %v161_v30 = vsel %vm104_vm1, %v157_v29, -inf }
 0x199   :  { %162 = vmax.xlane.f32.xlu2 %v161_v30 }
 0x19d   :  { %v285_v31 = vpop.f32.mrf.mxu2 }
 0x19e   :  { %v289_v35 = vmul.f32 0.35355338, %v285_v31 }
 0x19f   :  { %392 = vrot.lane.b32.xlu0 %v1190_v11, %s1141_s26 }
 0x1a0   :  { %v293_v36 = vsel %vm104_vm1, %v289_v35, -inf }
 0x1a5   :  { %v389_v32 = vpop.f32.mrf.mxu2 }
 0x1a6   :  { %v420_v33 = vmul.f32 0.35355338, %v389_v32 }
 0x1a8   :  { %v422_v34 = vsel %vm104_vm1, %v420_v33, -inf }
 0x1a9   :  { %423 = vmax.xlane.f32.xlu2 %v422_v34 }
 0x1ad   :  { %v521_v37 = vpop.f32.mrf.mxu2 }
 0x1ae   :  { %v1226_v38 = vmul.f32 0.35355338, %v521_v37 }
 0x1b0   :  { %v554_v39 = vsel %vm104_vm1, %v1226_v38, -inf }
 0x1c9   :  { %294 = vmax.xlane.f32.xlu0 %v293_v36 }
 0x1d1   :  { %555 = vmax.xlane.f32.xlu0 %v554_v39 }
 0x1fe   :  { %v160_v40 = vpop.xlane.xlu0 %159 }
 0x1ff   :  { %v164_v41 = vsub.f32 %v156_v26, %v160_v40 }
 0x201   :  { %v166_v42 = vmul.f32 1.442695, %v164_v41 }
 0x203   :  { %1012 = vpow2.f32 %v166_v42 }
 0x209   :  { %v1013_v43 = vpop.eup %1012 }
 0x20a   :  { %v170_v44 = vsel %vm104_vm1, %v1013_v43, 0.0 }
 0x20b   :  { %171 = vadd.xlane.f32.xlu1 %v170_v44 }
 0x20c   :  { %v163_v46 = vpop.xlane.xlu2 %162 }
 0x20d   :  { %v165_v60 = vsub.f32 %v157_v29, %v163_v46 }
 0x20f   :  { %v168_v62 = vmul.f32 1.442695, %v165_v60 }
 0x211   :  { %v393_v45 = vpop.permute.xlu0 %392 }
 0x212   :  { %914 = vmatmul.msk.f32.vlgmr.msrb.gmra.mxu0 %vm104_vm1, %v393_v45 }
 0x21c   :  { %v424_v47 = vpop.xlane.xlu2 %423 }
 0x21d   :  { %v428_v48 = vsub.f32 %v420_v33, %v424_v47 }
 0x21f   :  { %v430_v49 = vmul.f32 1.442695, %v428_v48 }
 0x221   :  { %1014 = vpow2.f32 %v430_v49 }
 0x224   :  { %524 = vrot.lane.b32.xlu1 %v1190_v11, %s1142_s27 }
 0x227   :  { %v1234_v50 = vpop.eup %1014 }
 0x228   :  { %v434_v51 = vsel %vm104_vm1, %v1234_v50, 0.0 }
 0x229   :  { %435 = vadd.xlane.f32.xlu0 %v434_v51 }
 0x23c   :  { %v295_v63 = vpop.xlane.xlu0 %294 }
 0x23d   :  { %v297_v5 = vsub.f32 %v289_v35, %v295_v63 }
 0x23f   :  { %v300_v10 = vmul.f32 1.442695, %v297_v5 }
 0x244   :  { %v556_v21 = vpop.xlane.xlu0 %555 }
 0x245   :  { %v560_v25 = vsub.f32 %v1226_v38, %v556_v21 }
 0x27e   :  { %v172_v52 = vpop.xlane.xlu1 %171 }
 0x27f   :  { %1016 = vrcp.f32 %v172_v52 }
 0x280   :  { %1018 = vpow2.f32 %v168_v62 }
 0x281   :  { %1020 = vpow2.f32 %v300_v10 }
 0x285   :  { %v1017_v53 = vpop.eup %1016 }
 0x286   :  { %v178_v54 = vmul.f32 %v1017_v53, %v1013_v43  ;;  %v1019_v12 = vpop.eup %1018 }
 0x287   :  { %v173_v13 = vsel %vm104_vm1, %v1019_v12, 0.0  ;;  %v1021_v14 = vpop.eup %1020 }
 0x288   :  { %903 = vmatmul.msk.f32.vlgmr.msrb.gmra.mxu1 %vm104_vm1, %v178_v54  ;;  %v305_v15 = vsel %vm104_vm1, %v1021_v14, 0.0 }
 0x28f   :  { %v417_v57 = vpop.f32.mrf.mxu0 }
 0x290   :  { %906 = vmatmul.msk.f32.vlgmr.msra.gmra.mxu1 %vm104_vm1, %v233_v19  ;;  %v421_v0 = vmul.f32 0.35355338, %v417_v57 }
 0x292   :  { %v425_v8 = vsel %vm104_vm1, %v421_v0, -inf }
 0x296   :  { %v525_v55 = vpop.permute.xlu1 %524 }
 0x297   :  { %920 = vmatmul.msk.f32.vlgmr.msra.gmra.mxu0 %vm104_vm1, %v525_v55 }
 0x29c   :  { %v436_v49 = vpop.xlane.xlu0 %435 }
 0x305   :  { %v1241_v56 = vpop.f32.mrf.mxu1 }
 0x30d   :  { %v257_v58 = vpop.f32.mrf.mxu1 }
 0x30e   :  { %v288_v59 = vmul.f32 0.35355338, %v257_v58 }
 0x310   :  { %v290_v61 = vsel %vm104_vm1, %v288_v59, -inf }
 0x311   :  { %291 = vmax.xlane.f32.xlu1 %v290_v61 }
 0x314   :  { %v549_v1 = vpop.f32.mrf.mxu0 }
 0x315   :  { %v553_v4 = vmul.f32 0.35355338, %v549_v1 }
 0x317   :  { %v557_v7 = vsel %vm104_vm1, %v553_v4, -inf }
 0x318   :  { %558 = vmax.xlane.f32.xlu2 %v557_v7 }
 0x319   :  { %426 = vmax.xlane.f32.xlu1 %v425_v8 }
 0x321   :  { %174 = vadd.xlane.f32.xlu1 %v173_v13 }
 0x329   :  { %306 = vadd.xlane.f32.xlu1 %v305_v15 }
 0x330   :  { %206 = vrot.lane.b32.xlu2 %v1190_v11, %s1134_s21 }
 0x338   :  { %993 = vrot.lane.b32.xlu2 %v992_v16, %s1143_s28 }
 0x340   :  { %576 = vrot.lane.b32.xlu2 %v1185_v9, %s1144_s29  ;;  %v562_v9 = vmul.f32 1.442695, %v560_v25 }
 0x342   :  { %988 = vrot.lane.b32.xlu1 %v992_v16, %s1145_s30 }
 0x34a   :  { %602 = vrot.lane.b32.xlu1 %v1190_v11, %s1144_s29 }
 0x384   :  { %v292_v17 = vpop.xlane.xlu1 %291 }
 0x385   :  { %v296_v18 = vsub.f32 %v288_v59, %v292_v17  ;;  %v961_v17 = vld [vmem:[#allocation5 + $0x18] sm:$0xff] }
 0x386   :  { %683 = vmatpush.bf16.msra.mxu2 %v961_v17 }
 0x387   :  { %v298_v19 = vmul.f32 1.442695, %v296_v18  ;;  %v960_v18 = vld [vmem:[#allocation5 + $0x10] sm:$0xff] }
 0x389   :  { %1022 = vpow2.f32 %v298_v19 }
 0x38a   :  { %684 = vmatpush.bf16.msra.mxu2 %v960_v18 }
 0x38b   :  { %v559_v20 = vpop.xlane.xlu2 %558 }
 0x38c   :  { %v427_v22 = vpop.xlane.xlu1 %426  ;;  %v561_v30 = vsub.f32 %v553_v4, %v559_v20 }
 0x38d   :  { %v429_v23 = vsub.f32 %v421_v0, %v427_v22 }
 0x38e   :  { %v564_v33 = vmul.f32 1.442695, %v561_v30 }
 0x38f   :  { %v1023_v24 = vpop.eup %1022  ;;  %v432_v26 = vmul.f32 1.442695, %v429_v23 }
 0x390   :  { %v302_v27 = vsel %vm104_vm1, %v1023_v24, 0.0 }
 0x391   :  { %1024 = vpow2.f32 %v432_v26  ;;  %303 = vadd.xlane.f32.xlu0 %v302_v27 }
 0x393   :  { %v207_v28 = vpop.permute.xlu2 %206 }
 0x394   :  { %227 = vmatpush.msra.mxu3 %v207_v28  ;;  %v175_v11 = vpop.xlane.xlu1 %174 }
 0x395   :  { %1026 = vrcp.f32 %v175_v11 }
 0x396   :  { %1028 = vpow2.f32 %v562_v9 }
 0x397   :  { %v1025_v29 = vpop.eup %1024  ;;  %1030 = vpow2.f32 %v564_v33  ;;  %v661_v33 = vperm.slane %v1182_v6, 1 }
 0x398   :  { %v437_v31 = vsel %vm104_vm1, %v1025_v29, 0.0 }
 0x399   :  { %438 = vadd.xlane.f32.xlu0 %v437_v31 }
 0x39b   :  { %v1027_v32 = vpop.eup %1026  ;;  %v994_v41 = vpop.permute.xlu2 %993 }
 0x39c   :  { %v179_v34 = vmul.f32 %v1027_v32, %v1019_v12  ;;  %v1029_v35 = vpop.eup %1028  ;;  %v307_v39 = vpop.xlane.xlu1 %306  ;;  %v995_v45 = vunpack.i.l.bf16 %v994_v41  ;;  %v996_v47 = vunpack.i.h.bf16 %v994_v41 }
 0x39d   :  { %v566_v36 = vsel %vm104_vm1, %v1029_v35, 0.0  ;;  %v1031_v37 = vpop.eup %1030  ;;  %1032 = vrcp.f32 %v307_v39 }
 0x39e   :  { %904 = vmatmul.msk.f32.vlgmr.msra.gmra.mxu3 %vm104_vm1, %v179_v34  ;;  %v569_v38 = vsel %vm104_vm1, %v1031_v37, 0.0 }
 0x3a1   :  { %567 = vadd.xlane.f32.xlu0 %v566_v36 }
 0x3a3   :  { %v1033_v40 = vpop.eup %1032  ;;  %v577_v55 = vpop.permute.xlu2 %576 }
 0x3a4   :  { %v311_v46 = vmul.f32 %v1033_v40, %v1021_v14 }
 0x3a9   :  { %570 = vadd.xlane.f32.xlu0 %v569_v38 }
 0x3b4   :  { %v989_v42 = vpop.permute.xlu1 %988 }
 0x3b5   :  { %v991_v43 = vunpack.i.h.bf16 %v989_v42  ;;  %v990_v44 = vunpack.i.l.bf16 %v989_v42 }
 0x3b7   :  { %333 = vmatpush.msrb.mxu3 %v990_v44  ;;  %359 = vmatpush.msrb.mxu1 %v991_v43 }
 0x3b8   :  { %910 = vmatmul.msk.f32.vlgmr.msrb.gmra.mxu1 %vm104_vm1, %v311_v46 }
 0x3b9   :  { %465 = vmatpush.msra.mxu3 %v995_v45  ;;  %491 = vmatpush.msra.mxu1 %v996_v47 }
 0x3bc   :  { %v603_v48 = vpop.permute.xlu1 %602 }
 0x3bd   :  { %623 = vmatpush.msrb.mxu1 %v603_v48 }
 0x404   :  { %v304_v51 = vpop.xlane.xlu0 %303 }
 0x405   :  { %1034 = vrcp.f32 %v304_v51  ;;  %v963_v51 = vld [vmem:[#allocation5 + $0x28] sm:$0xff] }
 0x406   :  { %1036 = vrcp.f32 %v436_v49  ;;  %764 = vmatpush.bf16.msrb.mxu0 %v963_v51 }
 0x40b   :  { %v1035_v52 = vpop.eup %1034 }
 0x40c   :  { %v439_v53 = vpop.xlane.xlu0 %438  ;;  %v310_v54 = vmul.f32 %v1035_v52, %v1023_v24  ;;  %v1037_v57 = vpop.eup %1036 }
 0x40d   :  { %1038 = vrcp.f32 %v439_v53  ;;  %v442_v59 = vmul.f32 %v1037_v57, %v1234_v50  ;;  %v962_v53 = vld [vmem:[#allocation5 + $0x20] sm:$0xff] }
 0x40e   :  { %909 = vmatmul.msk.f32.vlgmr.msrb.gmra.mxu3 %vm104_vm1, %v310_v54  ;;  %765 = vmatpush.bf16.msrb.mxu0 %v962_v53 }
 0x40f   :  { %597 = vmatpush.msrb.mxu3 %v577_v55 }
 0x413   :  { %v1039_v58 = vpop.eup %1038 }
 0x414   :  { %v443_v60 = vmul.f32 %v1039_v58, %v1025_v29  ;;  %v568_v61 = vpop.xlane.xlu0 %567 }
 0x415   :  { %1040 = vrcp.f32 %v568_v61 }
 0x416   :  { %915 = vmatmul.msk.f32.vlgmr.msra.gmra.mxu3 %vm104_vm1, %v442_v59  ;;  %916 = vmatmul.msk.f32.vlgmr.msra.gmra.mxu1 %vm104_vm1, %v443_v60 }
 0x41b   :  { %v1041_v62 = vpop.eup %1040 }
 0x41c   :  { %v574_v63 = vmul.f32 %v1041_v62, %v1029_v35  ;;  %v571_v0 = vpop.xlane.xlu0 %570 }
 0x41d   :  { %1042 = vrcp.f32 %v571_v0 }
 0x41e   :  { %921 = vmatmul.msk.f32.vlgmr.msrb.gmra.mxu3 %vm104_vm1, %v574_v63 }
 0x421   :  { %v229_v5 = vpop.f32.mrf.mxu3 }
 0x423   :  { %v1043_v1 = vpop.eup %1042 }
 0x424   :  { %v575_v4 = vmul.f32 %v1043_v1, %v1031_v37 }
 0x426   :  { %922 = vmatmul.msk.f32.vlgmr.msrb.gmra.mxu1 %vm104_vm1, %v575_v4 }
 0x435   :  { %v361_v7 = vpop.f32.mrf.mxu1 }
 0x491   :  { %v335_v50 = vpop.f32.mrf.mxu3 }
 0x492   :  { %v997_v8 = vpack.i.bf16 %v361_v7, %v335_v50  ;;  %v735_v50 = vperm.slane %v1182_v6, 4 }
 0x493   :  { %v493_v10 = vpop.f32.mrf.mxu1 }
 0x494   :  { %998 = vrot.lane.b32.xlu0 %v997_v8, %s1132_s18 }
 0x499   :  { %v467_v12 = vpop.f32.mrf.mxu3 }
 0x49a   :  { %v1002_v13 = vpack.i.bf16 %v493_v10, %v467_v12 }
 0x49c   :  { %1003 = vrot.lane.b32.xlu2 %v1002_v13, %s1146_s3  ;;  %v738_v13 = vperm.slane %v1182_v6, 5 }
 0x4a1   :  { %v599_v14 = vpop.f32.mrf.mxu3 }
 0x4a3   :  { %v625_v15 = vpop.f32.mrf.mxu1 }
 0x4a4   :  { %v1007_v16 = vpack.i.bf16 %v625_v15, %v599_v14 }
 0x4a6   :  { %1008 = vrot.lane.b32.xlu1 %v1007_v16, %s1147_s4 }
 0x4f6   :  { %v1004_v22 = vpop.permute.xlu2 %1003 }
 0x4f7   :  { %v1006_v25 = vunpack.i.h.bf16 %v1004_v22  ;;  %v1005_v26 = vunpack.i.l.bf16 %v1004_v22  ;;  %v965_v22 = vld [vmem:[#allocation5 + $0x38] sm:$0xff] }
 0x506   :  { %v999_v19 = vpop.permute.xlu0 %998 }
 0x507   :  { %v1001_v20 = vunpack.i.h.bf16 %v999_v19  ;;  %v1000_v21 = vunpack.i.l.bf16 %v999_v19 }
 0x509   :  { %v653_v23 = vsel %vm104_vm1, %v229_v5, %v1001_v20  ;;  %v652_v24 = vsel %vm104_vm1, %v1241_v56, %v1000_v21  ;;  %v967_v20 = vld [vmem:[#allocation5 + $0x48] sm:$0xff]  ;;  %v966_v21 = vld [vmem:[#allocation5 + $0x40] sm:$0xff] }
 0x50a   :  { %v655_v11 = vsel %vm654_vm2, %v652_v24, %v1005_v26  ;;  %v656_v29 = vsel %vm654_vm2, %v653_v23, %v1006_v25  ;;  %808 = vmatpush.bf16.msra.mxu3 %v967_v20  ;;  %v964_v23 = vld [vmem:[#allocation5 + $0x30] sm:$0xff]  ;;  %v742_v25 = vperm.slane %v1182_v6, 2 }
 0x50e   :  { %809 = vmatpush.bf16.msra.mxu3 %v966_v21 }
 0x512   :  { %810 = vmatpush.bf16.msra.mxu3 %v965_v22 }
 0x516   :  { %811 = vmatpush.bf16.msra.mxu3 %v964_v23 }
 0x518   :  { %v1009_v27 = vpop.permute.xlu1 %1008 }
 0x519   :  { %v1011_v9 = vunpack.i.h.bf16 %v1009_v27  ;;  %v1010_v28 = vunpack.i.l.bf16 %v1009_v27 }
 0x51b   :  { %v658_v30 = vsel %vm657_vm3, %v655_v11, %v1010_v28  ;;  %v659_v31 = vsel %vm657_vm3, %v656_v29, %v1011_v9 }
 0x51c   :  { %v660_v32 = vpack.c.bf16 %v659_v31, %v658_v30  ;;  %v775_v30 = vperm.slane %v1182_v6, 3 }
 0x51e   :  { %931 = vmatmul.msk.bf16.vlgmr.msra.gmra.mxu2 %vm83_vm0, %v660_v32 }
 0x5a1   :  { %v686_v34 = vpop.f32.mrf.mxu2 }
 0x5a2   :  { %v687_v35 = vadd.f32 %v686_v34, %v661_v33 }
 0x5a4   :  { %v691_v56 = vadd.f32 %v687_v35, %v1175_v2 }
 0x5a6   :  { %v693_v36 = vsel %vm83_vm0, %v691_v56, 0.0 }
 0x5a7   :  { %694 = vadd.xlane.f32.xlu2 %v693_v36 }
 0x5a9   :  { %v688_v37 = vpop.f32.mrf.mxu2 }
 0x5aa   :  { %v689_v38 = vadd.f32 %v688_v37, %v661_v33 }
 0x5ac   :  { %v692_v39 = vadd.f32 %v689_v38, %v1177_v3 }
 0x5ae   :  { %v696_v40 = vsel %vm83_vm0, %v692_v39, 0.0 }
 0x5af   :  { %697 = vadd.xlane.f32.xlu1 %v696_v40 }
 0x61a   :  { %v695_v41 = vpop.xlane.xlu2 %694 }
 0x61b   :  { %v699_v42 = vmul.f32 0.03125, %v695_v41 }
 0x61d   :  { %v701_v43 = vsub.f32 %v691_v56, %v699_v42 }
 0x61f   :  { %v703_v44 = vmul.f32 %v701_v43, %v701_v43 }
 0x621   :  { %v705_v45 = vsel %vm83_vm0, %v703_v44, 0.0 }
 0x622   :  { %v698_v46 = vpop.xlane.xlu1 %697  ;;  %706 = vadd.xlane.f32.xlu0 %v705_v45 }
 0x623   :  { %v700_v47 = vmul.f32 0.03125, %v698_v46 }
 0x625   :  { %v702_v2 = vsub.f32 %v692_v39, %v700_v47 }
 0x627   :  { %v704_v48 = vmul.f32 %v702_v2, %v702_v2 }
 0x629   :  { %v708_v49 = vsel %vm83_vm0, %v704_v48, 0.0 }
 0x62a   :  { %709 = vadd.xlane.f32.xlu2 %v708_v49 }
 0x695   :  { %v707_v3 = vpop.xlane.xlu0 %706 }
 0x696   :  { %v711_v52 = vmul.f32 0.032258064, %v707_v3 }
 0x698   :  { %1044 = vrsqrt.f32 %v711_v52  ;;  %vm719_vm5 = vweird.f32 %v711_v52 }
 0x69d   :  { %v710_v54 = vpop.xlane.xlu2 %709 }
 0x69e   :  { %v1045_v55 = vpop.eup %1044  ;;  %v712_v57 = vmul.f32 0.032258064, %v710_v54 }
 0x69f   :  { %v714_v58 = vmul.f32 %v1045_v55, %v711_v52  ;;  %vm720_vm4 = vweird.f32 %v1045_v55 }
 0x6a0   :  { %1046 = vrsqrt.f32 %v712_v57  ;;  %vm721_vm6 = vmor %vm719_vm5, %vm720_vm4  ;;  %vm729_vm8 = vweird.f32 %v712_v57 }
 0x6a1   :  { %v715_v59 = vmul.f32 %v1045_v55, %v714_v58 }
 0x6a3   :  { %v716_v60 = vmul.f32 0.5, %v715_v59 }
 0x6a5   :  { %v717_v61 = vsub.f32 1.5, %v716_v60  ;;  %v862_v60 = vperm.slane %v1182_v6, 6 }
 0x6a6   :  { %v1047_v62 = vpop.eup %1046 }
 0x6a7   :  { %v718_v63 = vmul.f32 %v1045_v55, %v717_v61  ;;  %v724_v0 = vmul.f32 %v1047_v62, %v712_v57  ;;  %vm730_vm7 = vweird.f32 %v1047_v62 }
 0x6a8   :  { %vm731_vm9 = vmor %vm729_vm8, %vm730_vm7 }
 0x6a9   :  { %v725_v1 = vmul.f32 %v1047_v62, %v724_v0  ;;  %v722_v4 = vsel %vm721_vm6, %v1045_v55, %v718_v63  ;;  %v865_v0 = vperm.slane %v1182_v6, 7 }
 0x6aa   :  { %v733_v8 = vmul.f32 %v722_v4, %v701_v43 }
 0x6ab   :  { %v726_v5 = vmul.f32 0.5, %v725_v1 }
 0x6ac   :  { %v736_v14 = vmul.f32 %v735_v50, %v733_v8 }
 0x6ad   :  { %v727_v7 = vsub.f32 1.5, %v726_v5 }
 0x6ae   :  { %v739_v17 = vadd.f32 %v738_v13, %v736_v14 }
 0x6af   :  { %v728_v10 = vmul.f32 %v1047_v62, %v727_v7 }
 0x6b1   :  { %v732_v12 = vsel %vm731_vm9, %v1047_v62, %v728_v10 }
 0x6b2   :  { %v734_v15 = vmul.f32 %v732_v12, %v702_v2 }
 0x6b4   :  { %v737_v16 = vmul.f32 %v735_v50, %v734_v15 }
 0x6b6   :  { %v740_v18 = vadd.f32 %v738_v13, %v737_v16 }
 0x6b8   :  { %v741_v19 = vpack.c.bf16 %v740_v18, %v739_v17 }
 0x6ba   :  { %940 = vmatmul.msk.bf16.vlgmr.msrb.gmra.mxu0 %vm83_vm0, %v741_v19 }
 0x737   :  { %v767_v24 = vpop.f32.mrf.mxu0 }
 0x738   :  { %v768_v26 = vadd.f32 %v767_v24, %v742_v25 }
 0x73a   :  { %v772_v28 = vmax.f32 %v768_v26, 0.0 }
 0x73f   :  { %v769_v27 = vpop.f32.mrf.mxu0 }
 0x740   :  { %v770_v9 = vadd.f32 %v769_v27, %v742_v25 }
 0x742   :  { %v773_v11 = vmax.f32 %v770_v9, 0.0 }
 0x744   :  { %v774_v29 = vpack.c.bf16 %v773_v11, %v772_v28 }
 0x746   :  { %957 = vmatmul.msk.bf16.vlgmr.msra.gmra.mxu3 %vm800_vm10, %v774_v29 }
 0x7c9   :  { %v813_v31 = vpop.f32.mrf.mxu3 }
 0x7ca   :  { %v814_v32 = vadd.f32 %v813_v31, %v775_v30 }
 0x7cc   :  { %v818_v33 = vadd.f32 %v814_v32, %v739_v17 }
 0x7ce   :  { %v820_v34 = vsel %vm83_vm0, %v818_v33, 0.0 }
 0x7cf   :  { %821 = vadd.xlane.f32.xlu1 %v820_v34 }
 0x7d1   :  { %v815_v35 = vpop.f32.mrf.mxu3 }
 0x7d2   :  { %v816_v56 = vadd.f32 %v815_v35, %v775_v30 }
 0x7d4   :  { %v819_v36 = vadd.f32 %v816_v56, %v740_v18 }
 0x7d6   :  { %v823_v37 = vsel %vm83_vm0, %v819_v36, 0.0 }
 0x7d7   :  { %824 = vadd.xlane.f32.xlu2 %v823_v37 }
 0x842   :  { %v822_v38 = vpop.xlane.xlu1 %821 }
 0x843   :  { %v826_v39 = vmul.f32 0.03125, %v822_v38 }
 0x845   :  { %v828_v40 = vsub.f32 %v818_v33, %v826_v39 }
 0x847   :  { %v830_v41 = vmul.f32 %v828_v40, %v828_v40 }
 0x849   :  { %v832_v42 = vsel %vm83_vm0, %v830_v41, 0.0 }
 0x84a   :  { %v825_v43 = vpop.xlane.xlu2 %824  ;;  %833 = vadd.xlane.f32.xlu0 %v832_v42 }
 0x84b   :  { %v827_v44 = vmul.f32 0.03125, %v825_v43 }
 0x84d   :  { %v829_v45 = vsub.f32 %v819_v36, %v827_v44 }
 0x84f   :  { %v831_v46 = vmul.f32 %v829_v45, %v829_v45 }
 0x851   :  { %v835_v47 = vsel %vm83_vm0, %v831_v46, 0.0 }
 0x852   :  { %836 = vadd.xlane.f32.xlu1 %v835_v47 }
 0x8bd   :  { %v834_v2 = vpop.xlane.xlu0 %833 }
 0x8be   :  { %v838_v48 = vmul.f32 0.032258064, %v834_v2 }
 0x8c0   :  { %1048 = vrsqrt.f32 %v838_v48  ;;  %vm846_vm12 = vweird.f32 %v838_v48 }
 0x8c5   :  { %v837_v49 = vpop.xlane.xlu1 %836 }
 0x8c6   :  { %v1049_v51 = vpop.eup %1048  ;;  %v839_v3 = vmul.f32 0.032258064, %v837_v49 }
 0x8c7   :  { %v841_v52 = vmul.f32 %v1049_v51, %v838_v48  ;;  %vm847_vm11 = vweird.f32 %v1049_v51 }
 0x8c8   :  { %1050 = vrsqrt.f32 %v839_v3  ;;  %vm848_vm13 = vmor %vm846_vm12, %vm847_vm11  ;;  %vm856_vm15 = vweird.f32 %v839_v3 }
 0x8c9   :  { %v842_v53 = vmul.f32 %v1049_v51, %v841_v52 }
 0x8cb   :  { %v843_v54 = vmul.f32 0.5, %v842_v53 }
 0x8cd   :  { %v844_v55 = vsub.f32 1.5, %v843_v54 }
 0x8ce   :  { %v1051_v57 = vpop.eup %1050 }
 0x8cf   :  { %v845_v58 = vmul.f32 %v1049_v51, %v844_v55  ;;  %v851_v59 = vmul.f32 %v1051_v57, %v839_v3  ;;  %vm857_vm14 = vweird.f32 %v1051_v57 }
 0x8d0   :  { %vm858_vm1 = vmor %vm856_vm15, %vm857_vm14 }
 0x8d1   :  { %v849_v61 = vsel %vm848_vm13, %v1049_v51, %v845_v58  ;;  %v852_v62 = vmul.f32 %v1051_v57, %v851_v59 }
 0x8d2   :  { %v860_v63 = vmul.f32 %v849_v61, %v828_v40 }
 0x8d3   :  { %v853_v1 = vmul.f32 0.5, %v852_v62 }
 0x8d4   :  { %v863_v4 = vmul.f32 %v862_v60, %v860_v63 }
 0x8d5   :  { %v854_v5 = vsub.f32 1.5, %v853_v1 }
 0x8d6   :  { %v866_v7 = vadd.f32 %v865_v0, %v863_v4 }
 0x8d7   :  { %v855_v50 = vmul.f32 %v1051_v57, %v854_v5 }
 0x8d8   :  { %868 = vst.msk [vmem:[#allocation7] sm:$0xff] %vm83_vm0, %v866_v7 }
 0x8d9   :  { %v859_v8 = vsel %vm858_vm1, %v1051_v57, %v855_v50 }
 0x8da   :  { %v861_v10 = vmul.f32 %v859_v8, %v829_v45 }
 0x8dc   :  { %v864_v12 = vmul.f32 %v862_v60, %v861_v10 }
 0x8de   :  { %v867_v6 = vadd.f32 %v865_v0, %v864_v12 }
 0x8e0   :  { %869 = vst.msk [vmem:[#allocation7 + $0x8] sm:$0xff] %vm83_vm0, %v867_v6 }
 0x8e1   :  { %882 = dma.vmem_to_hbm [thread:$0]  %s875_s6, 256, %s877_s9, [#allocation4], %s1131_s17, %s1131_s17, %s1132_s18  }
 0x8e2   :  { %1128 = dma.done.wait [#allocation4], 256  }
 0x8e3   :  { %1129 = vsyncadd [#allocation4], 4294967040 }
 0x8e4   :  { %887 = vsyncpa [#allocation3], 1 }
 0x8e5   :  { %888 = vsyncpa [#allocation6], 1 }
 0x8e6   :  { %889 = vsyncpa [#allocation4], 1 }

</bundles_post_ra>
